<compile_context>
chip_gen: v7x
topology: tpu7x:2x2x1
jax: 0.10.0
libtpu: 0.0.40
codegen_flags: <defaults>
</compile_context>

<pallas_src>
import jax
import jax.numpy as jnp
from jax import lax
from jax.experimental import pallas as pl
from jax.experimental.pallas import tpu as pltpu

VEC_LEN = 50
FEAT = 5 * VEC_LEN      # 250 — logical feature dim of nn.Linear(250, 250)
FEAT_PAD = 256          # next multiple of 128: unmasked vld/vst, clean MXU tiles


def linear_kernel(x_ref, w_ref, b_ref, o_ref):
    # x_ref: (B, FEAT_PAD)         VMEM, lanes [FEAT:FEAT_PAD] zero-filled
    # w_ref: (FEAT_PAD, FEAT_PAD)  VMEM, pre-transposed [in, out], zero-padded
    # b_ref: (1, FEAT_PAD)         VMEM, zero-padded
    # Plain NN-form contraction (x dim 1 against w dim 0): no trans-b
    # legalization, single weight-stationary MXU pass, f32 accumulation.
    acc = lax.dot_general(
        x_ref[...],
        w_ref[...],
        dimension_numbers=(((1,), (0,)), ((), ())),
        preferred_element_type=jnp.float32,
    )
    o_ref[...] = (acc + b_ref[...]).astype(o_ref.dtype)


def prepare_params(weight, bias):
    """One-time (init-time) parameter prep — NOT on the per-call forward path.

    weight: (FEAT, FEAT) float32, PyTorch layout [out_features, in_features]
    bias:   (FEAT,)      float32

    Returns:
      w_pad: (FEAT_PAD, FEAT_PAD) = weight.T zero-padded  ([in, out] layout)
      b_pad: (1, FEAT_PAD)        zero-padded

    The padded K rows / N lanes MUST be zero so the 256-wide contraction and
    bias add are exact for the logical 250-dim problem.
    """
    w_t = weight.T  # [in, out]
    w_pad = jnp.zeros((FEAT_PAD, FEAT_PAD), weight.dtype).at[:FEAT, :FEAT].set(w_t)
    b_pad = jnp.zeros((1, FEAT_PAD), bias.dtype).at[0, :FEAT].set(bias)
    return w_pad, b_pad


def nntorch_forward(x, w_pad, b_pad):
    """Equivalent of NNtorch.forward: y = x @ W^T + b.

    x:     (B, FEAT)              float32
    w_pad: (FEAT_PAD, FEAT_PAD)   from prepare_params (pre-transposed + padded)
    b_pad: (1, FEAT_PAD)          from prepare_params
    Returns (B, FEAT).
    """
    B = x.shape[0]
    # Pad x's lane dim 250 -> 256 with zeros. Tiny (B*6 floats); fuses under
    # jit, unlike the 250 KB per-call weight transpose this replaces.
    x_pad = jnp.pad(x, ((0, 0), (0, FEAT_PAD - FEAT)))

    itemsize = jnp.dtype(x.dtype).itemsize
    cost = pl.CostEstimate(
        flops=2 * B * FEAT_PAD * FEAT_PAD,
        transcendentals=0,
        bytes_accessed=(x_pad.size + w_pad.size + b_pad.size + B * FEAT_PAD)
        * itemsize,
    )

    y_pad = pl.pallas_call(
        linear_kernel,
        out_shape=jax.ShapeDtypeStruct((B, FEAT_PAD), x.dtype),
        in_specs=[
            pl.BlockSpec(memory_space=pltpu.MemorySpace.VMEM),  # x (padded)
            pl.BlockSpec(memory_space=pltpu.MemorySpace.VMEM),  # weight [in,out], padded
            pl.BlockSpec(memory_space=pltpu.MemorySpace.VMEM),  # bias (padded)
        ],
        out_specs=pl.BlockSpec(memory_space=pltpu.MemorySpace.VMEM),
        cost_estimate=cost,
    )(x_pad, w_pad, b_pad)

    return y_pad[:, :FEAT]


if __name__ == "__main__":
    key = jax.random.PRNGKey(0)
    k_x, k_w, k_b = jax.random.split(key, 3)

    B = 2
    # Deterministic parameter init mimicking nn.Linear's U(-1/sqrt(in), 1/sqrt(in)).
    bound = 1.0 / jnp.sqrt(jnp.float32(FEAT))
    weight = jax.random.uniform(k_w, (FEAT, FEAT), jnp.float32, -bound, bound)
    bias = jax.random.uniform(k_b, (FEAT,), jnp.float32, -bound, bound)
    x = jax.random.normal(k_x, (B, FEAT), jnp.float32)

    # One-time parameter prep (transpose + pad) — outside the forward path.
    w_pad, b_pad = prepare_params(weight, bias)

    fwd = jax.jit(nntorch_forward)
    y = fwd(x, w_pad, b_pad)
    jax.block_until_ready(y)

    # Sanity-check against plain-JAX reference of the original module.
    y_ref = x @ weight.T + bias
    assert y.shape == (B, FEAT)
    assert jnp.allclose(y, y_ref, atol=1e-4, rtol=1e-4)

    print("KERNEL_OK")
</pallas_src>

<mosaic_0001>
module attributes {stable_mosaic.version = 11 : i64} {
  func.func @linear_kernel(%arg0: memref<2x256xf32, #tpu.memory_space<vmem>>, %arg1: memref<256x256xf32, #tpu.memory_space<vmem>>, %arg2: memref<1x256xf32, #tpu.memory_space<vmem>>, %arg3: memref<2x256xf32, #tpu.memory_space<vmem>>) attributes {dimension_semantics = [], scalar_prefetch = 0 : i64, scratch_operands = 0 : i64, tpu.core_type = #tpu.core_type<tc>} {
    %c0 = arith.constant 0 : index
    %c0_0 = arith.constant 0 : index
    %0 = vector.load %arg0[%c0, %c0_0] : memref<2x256xf32, #tpu.memory_space<vmem>>, vector<2x256xf32>
    %c0_1 = arith.constant 0 : index
    %c0_2 = arith.constant 0 : index
    %1 = vector.load %arg1[%c0_1, %c0_2] : memref<256x256xf32, #tpu.memory_space<vmem>>, vector<256x256xf32>
    %cst = arith.constant dense<0.000000e+00> : vector<2x256xf32>
    %2 = tpu.matmul %0, %1, %cst {dimension_numbers = #tpu.dot_dimension_numbers<[1], [0], [0], [1], [0, 0, 1, 1], [], []>} : vector<2x256xf32>, vector<256x256xf32>, vector<2x256xf32> -> vector<2x256xf32>
    %c0_3 = arith.constant 0 : index
    %c0_4 = arith.constant 0 : index
    %3 = vector.load %arg2[%c0_3, %c0_4] : memref<1x256xf32, #tpu.memory_space<vmem>>, vector<1x256xf32>
    %4 = vector.broadcast %3 : vector<1x256xf32> to vector<2x256xf32>
    %5 = arith.addf %2, %4 : vector<2x256xf32>
    %c0_5 = arith.constant 0 : index
    %c0_6 = arith.constant 0 : index
    %6 = vector.load %arg3[%c0_5, %c0_6] : memref<2x256xf32, #tpu.memory_space<vmem>>, vector<2x256xf32>
    tpu.vector_store %arg3[%c0_5, %c0_6], %5 {strides = array<i32>} : memref<2x256xf32, #tpu.memory_space<vmem>>, vector<2x256xf32>,
    return
  }
}

</mosaic_0001>

<bundles_post_ra>
// kernel: nntorch_forward.1
= control target key start
LH: loop header
LB: loop body
LE: loop exit
PB: predicated region body
PF: predicated region fallthrough
CT: control target
= control target key end

     0   :  { %8 = vsyncpa [#allocation3], 0  ;;  %s392_s0 = inlined_call_operand.vmem [shape: f32[2,256], index: 0, kind: input, shape index: {}]   ;;  %s393_s1 = inlined_call_operand.hbm [shape: f32[256,256], index: 1, kind: input, shape index: {}]   ;;  %s394_s2 = inlined_call_operand.vmem [shape: f32[1,256], index: 2, kind: input, shape index: {}]   ;;  %s395_s3 = inlined_call_operand.hbm [shape: f32[2,256], index: 3, kind: output, shape index: {}]  }
   0x1   :  { %9 = vsyncpa [#allocation4], 0  ;;  %s333_s12 = smov [#allocation2]   ;;  %s285_s16 = scalar_lea.hbm %s393_s1, 8192 }
   0x2   :  { %s17_s13 = sshll.u32 %s333_s12, 4  ;;  %p286_p0 = scmp.ne.s32.totalorder %s393_s1, %s285_s16  ;;  %s18_s13 = int_to_ptr.vmem [resolvable:$true] %s17_s13 }
   0x3   :  { %p289_p1 = scmp.lt.u32.totalorder %s285_s16, %s393_s1 }
   0x5   :  { %p291_p2 = pnand %p289_p1, %p286_p0 }
   0x7   :  { %294 = shalt.err (!%p291_p2)
}
   0x8   :  { %s295_s21 = scalar_lea.vmem %s18_s13, 8192  ;;  %p300_p4 = scmp.lt.s32.totalorder %s18_s13, %s18_s13 }
   0x9   :  { %p296_p3 = scmp.ne.s32.totalorder %s18_s13, %s295_s21  ;;  %p301_p5 = scmp.lt.s32.totalorder %s295_s21, %s295_s21 }
   0xb   :  { %p302_p6 = por %p301_p5, %p300_p4 }
   0xd   :  { %p303_p7 = pnand %p302_p6, %p296_p3 }
   0xf   :  { %306 = shalt.err (!%p303_p7)
}
  0x10   :  { %s334_s22 = smov 256   ;;  %s335_s23 = smov 16  }
  0x11   :  { %23 = dma.hbm_to_vmem [thread:$0]  %s393_s1, 8192, %s18_s13, [#allocation3], %s334_s22, %s334_s22, %s335_s23  }
  0x12   :  { %329 = dma.done.wait [#allocation3], 8192  }
  0x13   :  { %330 = vsyncadd [#allocation3], 4294959104  ;;  %v31_v0 = vld [vmem:[#allocation2 + $0x8] sm:$0xff]  ;;  %v33_v1 = vld [vmem:[#allocation2 + $0x18] sm:$0xff]  ;;  %s336_s28 = smov [#allocation5]  }
  0x14   :  { %v30_v2 = vld [vmem:[#allocation2] sm:$0xff]  ;;  %v217_v3 = vpack.c.bf16 %v33_v1, %v31_v0  ;;  %v32_v4 = vld [vmem:[#allocation2 + $0x10] sm:$0xff]  ;;  %v35_v5 = vld [vmem:[#allocation2 + $0x28] sm:$0xff]  ;;  %s206_s29 = sshll.u32 %s336_s28, 4  ;;  %s207_s29 = int_to_ptr.vmem [resolvable:$true] %s206_s29 }
  0x15   :  { %v37_v6 = vld [vmem:[#allocation2 + $0x38] sm:$0xff]  ;;  %v219_v7 = vpack.c.bf16 %v32_v4, %v30_v2  ;;  %v34_v9 = vld [vmem:[#allocation2 + $0x20] sm:$0xff]  ;;  %v36_v10 = vld [vmem:[#allocation2 + $0x30] sm:$0xff]  ;;  %s307_s30 = scalar_lea.vmem %s207_s29, 64  ;;  %p312_p9 = scmp.lt.s32.totalorder %s207_s29, %s207_s29 }
  0x16   :  { %v221_v8 = vpack.c.bf16 %v37_v6, %v35_v5  ;;  %v39_v11 = vld [vmem:[#allocation2 + $0x48] sm:$0xff]  ;;  %218 = vmatprep.subr.bf16.mxu0 %v217_v3  ;;  %v41_v12 = vld [vmem:[#allocation2 + $0x58] sm:$0xff]  ;;  %v223_v13 = vpack.c.bf16 %v36_v10, %v34_v9  ;;  %v38_v15 = vld [vmem:[#allocation2 + $0x40] sm:$0xff]  ;;  %p308_p8 = scmp.ne.s32.totalorder %s207_s29, %s307_s30  ;;  %p313_p10 = scmp.lt.s32.totalorder %s307_s30, %s307_s30 }
  0x17   :  { %220 = vmatpush1.bf16.msra.mxu0 %v219_v7  ;;  %v225_v14 = vpack.c.bf16 %v41_v12, %v39_v11  ;;  %v40_v16 = vld [vmem:[#allocation2 + $0x50] sm:$0xff]  ;;  %v43_v17 = vld [vmem:[#allocation2 + $0x68] sm:$0xff]  ;;  %v45_v18 = vld [vmem:[#allocation2 + $0x78] sm:$0xff] }
  0x18   :  { %222 = vmatprep.subr.bf16.mxu0 %v221_v8  ;;  %v227_v19 = vpack.c.bf16 %v40_v16, %v38_v15  ;;  %v229_v20 = vpack.c.bf16 %v45_v18, %v43_v17  ;;  %v42_v21 = vld [vmem:[#allocation2 + $0x60] sm:$0xff]  ;;  %v44_v22 = vld [vmem:[#allocation2 + $0x70] sm:$0xff]  ;;  %v47_v23 = vld [vmem:[#allocation2 + $0x88] sm:$0xff]  ;;  %p314_p11 = por %p313_p10, %p312_p9 }
  0x19   :  { %v49_v24 = vld [vmem:[#allocation2 + $0x98] sm:$0xff]  ;;  %v231_v25 = vpack.c.bf16 %v44_v22, %v42_v21  ;;  %v46_v27 = vld [vmem:[#allocation2 + $0x80] sm:$0xff]  ;;  %v48_v28 = vld [vmem:[#allocation2 + $0x90] sm:$0xff] }
  0x1a   :  { %v233_v26 = vpack.c.bf16 %v49_v24, %v47_v23  ;;  %v51_v29 = vld [vmem:[#allocation2 + $0xa8] sm:$0xff]  ;;  %v53_v30 = vld [vmem:[#allocation2 + $0xb8] sm:$0xff]  ;;  %v235_v31 = vpack.c.bf16 %v48_v28, %v46_v27  ;;  %v50_v33 = vld [vmem:[#allocation2 + $0xa0] sm:$0xff]  ;;  %p315_p12 = pnand %p314_p11, %p308_p8 }
  0x1b   :  { %224 = vmatpush1.bf16.msra.mxu0 %v223_v13  ;;  %v237_v32 = vpack.c.bf16 %v53_v30, %v51_v29  ;;  %v52_v34 = vld [vmem:[#allocation2 + $0xb0] sm:$0xff]  ;;  %v55_v35 = vld [vmem:[#allocation2 + $0xc8] sm:$0xff]  ;;  %v57_v36 = vld [vmem:[#allocation2 + $0xd8] sm:$0xff] }
  0x1c   :  { %226 = vmatprep.subr.bf16.mxu0 %v225_v14  ;;  %v239_v37 = vpack.c.bf16 %v52_v34, %v50_v33  ;;  %v241_v38 = vpack.c.bf16 %v57_v36, %v55_v35  ;;  %v54_v39 = vld [vmem:[#allocation2 + $0xc0] sm:$0xff]  ;;  %v56_v40 = vld [vmem:[#allocation2 + $0xd0] sm:$0xff]  ;;  %v372_v41 = vld.sshfl [vmem:[%s392_s0] sm:$0x33 pattern:$0x76325410]  ;;  %v96_v34 = vlaneseq }
  0x1d   :  { %v59_v42 = vld [vmem:[#allocation2 + $0xe8] sm:$0xff]  ;;  %v61_v43 = vld [vmem:[#allocation2 + $0xf8] sm:$0xff]  ;;  %v114_v44 = vcombine.high %v372_v41, %v372_v41  ;;  %v243_v45 = vpack.c.bf16 %v56_v40, %v54_v39  ;;  %v58_v47 = vld [vmem:[#allocation2 + $0xe0] sm:$0xff] }
  0x1e   :  { %v245_v46 = vpack.c.bf16 %v61_v43, %v59_v42  ;;  %v60_v48 = vld [vmem:[#allocation2 + $0xf0] sm:$0xff]  ;;  %v63_v49 = vld [vmem:[#allocation2 + $0x108] sm:$0xff]  ;;  %v65_v50 = vld [vmem:[#allocation2 + $0x118] sm:$0xff]  ;;  %v97_v35 = vshrl.u32 %v96_v34, 7 }
  0x1f   :  { %228 = vmatpush1.bf16.msra.mxu0 %v227_v19  ;;  %181 = vmatprep.mubr.f32.mxu0 %v114_v44  ;;  %v247_v51 = vpack.c.bf16 %v60_v48, %v58_v47  ;;  %v249_v52 = vpack.c.bf16 %v65_v50, %v63_v49  ;;  %v62_v53 = vld [vmem:[#allocation2 + $0x100] sm:$0xff]  ;;  %v64_v54 = vld [vmem:[#allocation2 + $0x110] sm:$0xff]  ;;  %v67_v55 = vld [vmem:[#allocation2 + $0x128] sm:$0xff] }
  0x20   :  { %230 = vmatprep.subr.bf16.mxu0 %v229_v20  ;;  %v69_v56 = vld [vmem:[#allocation2 + $0x138] sm:$0xff]  ;;  %v251_v57 = vpack.c.bf16 %v64_v54, %v62_v53  ;;  %v66_v59 = vld [vmem:[#allocation2 + $0x120] sm:$0xff]  ;;  %v68_v60 = vld [vmem:[#allocation2 + $0x130] sm:$0xff]  ;;  %v98_v36 = vsub.s32 0, %v97_v35 }
  0x21   :  { %v253_v58 = vpack.c.bf16 %v69_v56, %v67_v55  ;;  %v71_v61 = vld [vmem:[#allocation2 + $0x148] sm:$0xff]  ;;  %v73_v62 = vld [vmem:[#allocation2 + $0x158] sm:$0xff]  ;;  %v255_v63 = vpack.c.bf16 %v68_v60, %v66_v59  ;;  %v70_v1 = vld [vmem:[#allocation2 + $0x140] sm:$0xff] }
  0x22   :  { %v257_v0 = vpack.c.bf16 %v73_v62, %v71_v61  ;;  %v72_v2 = vld [vmem:[#allocation2 + $0x150] sm:$0xff]  ;;  %v75_v3 = vld [vmem:[#allocation2 + $0x168] sm:$0xff]  ;;  %v77_v4 = vld [vmem:[#allocation2 + $0x178] sm:$0xff] }
  0x23   :  { %232 = vmatpush1.bf16.msra.mxu0 %v231_v25  ;;  %v259_v5 = vpack.c.bf16 %v72_v2, %v70_v1  ;;  %v261_v6 = vpack.c.bf16 %v77_v4, %v75_v3  ;;  %v74_v7 = vld [vmem:[#allocation2 + $0x160] sm:$0xff]  ;;  %v76_v8 = vld [vmem:[#allocation2 + $0x170] sm:$0xff]  ;;  %v79_v9 = vld [vmem:[#allocation2 + $0x188] sm:$0xff] }
  0x24   :  { %234 = vmatprep.subr.bf16.mxu0 %v233_v26  ;;  %v81_v10 = vld [vmem:[#allocation2 + $0x198] sm:$0xff]  ;;  %v263_v11 = vpack.c.bf16 %v76_v8, %v74_v7  ;;  %v78_v13 = vld [vmem:[#allocation2 + $0x180] sm:$0xff]  ;;  %v80_v14 = vld [vmem:[#allocation2 + $0x190] sm:$0xff] }
  0x25   :  { %v265_v12 = vpack.c.bf16 %v81_v10, %v79_v9  ;;  %v83_v15 = vld [vmem:[#allocation2 + $0x1a8] sm:$0xff]  ;;  %v85_v16 = vld [vmem:[#allocation2 + $0x1b8] sm:$0xff]  ;;  %v267_v17 = vpack.c.bf16 %v80_v14, %v78_v13  ;;  %v82_v19 = vld [vmem:[#allocation2 + $0x1a0] sm:$0xff] }
  0x26   :  { %v269_v18 = vpack.c.bf16 %v85_v16, %v83_v15  ;;  %v84_v20 = vld [vmem:[#allocation2 + $0x1b0] sm:$0xff]  ;;  %v87_v21 = vld [vmem:[#allocation2 + $0x1c8] sm:$0xff]  ;;  %v89_v22 = vld [vmem:[#allocation2 + $0x1d8] sm:$0xff] }
  0x27   :  { %236 = vmatpush1.bf16.msra.mxu0 %v235_v31  ;;  %v271_v23 = vpack.c.bf16 %v84_v20, %v82_v19  ;;  %v273_v24 = vpack.c.bf16 %v89_v22, %v87_v21  ;;  %v86_v25 = vld [vmem:[#allocation2 + $0x1c0] sm:$0xff]  ;;  %v88_v26 = vld [vmem:[#allocation2 + $0x1d0] sm:$0xff]  ;;  %v91_v27 = vld [vmem:[#allocation2 + $0x1e8] sm:$0xff] }
  0x28   :  { %238 = vmatprep.subr.bf16.mxu0 %v237_v32  ;;  %v93_v28 = vld [vmem:[#allocation2 + $0x1f8] sm:$0xff]  ;;  %v275_v29 = vpack.c.bf16 %v88_v26, %v86_v25  ;;  %v90_v31 = vld [vmem:[#allocation2 + $0x1e0] sm:$0xff]  ;;  %v92_v32 = vld [vmem:[#allocation2 + $0x1f0] sm:$0xff] }
  0x29   :  { %v277_v30 = vpack.c.bf16 %v93_v28, %v91_v27  ;;  %v279_v33 = vpack.c.bf16 %v92_v32, %v90_v31 }
  0x2b   :  { %240 = vmatpush1.bf16.msra.mxu0 %v239_v37  ;;  %v94_v37 = vld [vmem:[%s394_s2] sm:$0x3] }
  0x2c   :  { %242 = vmatprep.subr.bf16.mxu0 %v241_v38  ;;  %v102_v38 = vsub.s32 1, %v97_v35  ;;  %v99_v39 = vrot.slane %v94_v37, %v98_v36 }
  0x2e   :  { %v103_v40 = vrot.slane %v94_v37, %v102_v38 }
  0x2f   :  { %244 = vmatpush1.bf16.msra.mxu0 %v243_v45 }
  0x30   :  { %246 = vmatprep.subr.bf16.mxu0 %v245_v46 }
  0x33   :  { %248 = vmatpush1.bf16.msra.mxu0 %v247_v51 }
  0x34   :  { %250 = vmatprep.subr.bf16.mxu0 %v249_v52 }
  0x37   :  { %252 = vmatpush1.bf16.msra.mxu0 %v251_v57 }
  0x38   :  { %254 = vmatprep.subr.bf16.mxu0 %v253_v58 }
  0x3b   :  { %256 = vmatpush1.bf16.msra.mxu0 %v255_v63 }
  0x3c   :  { %258 = vmatprep.subr.bf16.mxu0 %v257_v0 }
  0x3f   :  { %260 = vmatpush1.bf16.msra.mxu0 %v259_v5 }
  0x40   :  { %262 = vmatprep.subr.bf16.mxu0 %v261_v6 }
  0x43   :  { %264 = vmatpush1.bf16.msra.mxu0 %v263_v11 }
  0x44   :  { %266 = vmatprep.subr.bf16.mxu0 %v265_v12 }
  0x47   :  { %268 = vmatpush1.bf16.msra.mxu0 %v267_v17 }
  0x48   :  { %270 = vmatprep.subr.bf16.mxu0 %v269_v18 }
  0x4b   :  { %272 = vmatpush1.bf16.msra.mxu0 %v271_v23 }
  0x4c   :  { %274 = vmatprep.subr.bf16.mxu0 %v273_v24 }
  0x4f   :  { %276 = vmatpush1.bf16.msra.mxu0 %v275_v29 }
  0x50   :  { %278 = vmatprep.subr.bf16.mxu0 %v277_v30 }
  0x53   :  { %280 = vmatpush1.bf16.msra.mxu0 %v279_v33 }
  0x56   :  { %182 = vmatmul.mubr.f32.vlgmr.msra.gmra.mrb[0].mxu0 %v372_v41 }
 0x129   :  { %v183_v42 = vpop.f32.mrb[0].mxu0 }
 0x12a   :  { %v184_v43 = vadd.f32 %v183_v42, %v99_v39  ;;  %v185_v44 = vpop.f32.mrb[1].mxu0 }
 0x12b   :  { %v186_v45 = vadd.f32 %v185_v44, %v103_v40 }
 0x12d   :  { %v190_v46 = vcombine.low %v184_v43, %v186_v45 }
 0x12f   :  { %216 = vst.sshfl [vmem:[#allocation5] sm:$0x33 pattern:$0x76325410] %v190_v46 }
 0x130   :  { %318 = shalt.err (!%p315_p12)
}
 0x131   :  { %s319_s5 = scalar_lea.hbm %s395_s3, 64 }
 0x132   :  { %p320_p13 = scmp.ne.s32.totalorder %s395_s3, %s319_s5  ;;  %p323_p0 = scmp.lt.u32.totalorder %s319_s5, %s395_s3 }
 0x134   :  { %p325_p1 = pnand %p323_p0, %p320_p13 }
 0x136   :  { %328 = shalt.err (!%p325_p1)
}
 0x137   :  { %209 = dma.vmem_to_hbm [thread:$0]  %s207_s29, 64, %s395_s3, [#allocation4]  }
 0x138   :  { %331 = dma.done.wait [#allocation4], 64  }
 0x139   :  { %332 = vsyncadd [#allocation4], 4294967232 }
 0x13a   :  { %213 = vsyncpa [#allocation3], 1 }
 0x13b   :  { %214 = vsyncpa [#allocation4], 1 }

</bundles_post_ra>
